<compile_context>
chip_gen: v7x
topology: tpu7x:2x2x1
jax: 0.10.0
libtpu: 0.0.40
codegen_flags: <defaults>
</compile_context>

<pallas_src>
import functools

import jax
import jax.numpy as jnp
from jax.experimental import pallas as pl
from jax.experimental.pallas import tpu as pltpu

# ---- module hyper-params (NeRFSmall_c defaults) -----------------------------
NUM_LAYERS       = 3
HIDDEN_DIM       = 64
GEO_FEAT_DIM     = 15
NUM_LAYERS_COLOR = 2
HIDDEN_DIM_COLOR = 16
INPUT_CH         = 3
SIGMA_OUT_DIM    = 1 + GEO_FEAT_DIM   # 16

# One grid step processes BLOCK_N points; the body walks CHUNK_N-lane chunks.
DEFAULT_BLOCK_N = 2048   # sweep 2048-8192 for very large N
DEFAULT_CHUNK_N = 512    # bounds (64, CHUNK_N) f32 activation to ~32 vregs


def _nerf_small_c_kernel(x_ref, w0_ref, w1_ref, w2_ref,
                         cw0_ref, cw1_ref, cb_ref, out_ref, *, chunk_n):
    """All activations are (features, chunk_n): points live on the lane axis."""
    cdt = w0_ref.dtype                      # MXU operand dtype (f32 or bf16)
    block_n = x_ref.shape[-1]
    n_chunks = block_n // chunk_n

    @pl.loop(0, n_chunks)
    def _(c):
        off = pl.multiple_of(c * chunk_n, chunk_n)
        xb = x_ref[:, pl.ds(off, chunk_n)]                           # (3, C)

        # ---- sigma net: Linear(no bias) -> ReLU, x3 (ReLU also after last) --
        h = jnp.dot(w0_ref[...], xb, preferred_element_type=jnp.float32)
        h = jnp.maximum(h, 0.0)                                      # (64, C)
        h = jnp.dot(w1_ref[...], h.astype(cdt),
                    preferred_element_type=jnp.float32)
        h = jnp.maximum(h, 0.0)                                      # (64, C)
        h = jnp.dot(w2_ref[...], h.astype(cdt),
                    preferred_element_type=jnp.float32)
        h = jnp.maximum(h, 0.0)                                      # (16, C); row 0 == sigma

        # ---- color net ------------------------------------------------------
        # cw0_ref is (16, 16) with COLUMN 0 zeroed, so
        #   cw0 @ h == W_color0 @ h[1:, :]   (== color_net[0](sigma[..., 1:]))
        cb0 = cb_ref[:, 0:1]                                         # (16, 1) f32
        col = jnp.dot(cw0_ref[...], h.astype(cdt),
                      preferred_element_type=jnp.float32) + cb0
        col = jnp.maximum(col, 0.0)                                  # (16, C)
        cb1 = cb_ref[0:1, 1:2]                                       # (1, 1) f32
        color = jnp.dot(cw1_ref[...], col.astype(cdt),
                        preferred_element_type=jnp.float32) + cb1    # (1, C)

        # ---- lane-dense packed output: row 0 = sigma, row 1 = color ---------
        out_ref[0:1, pl.ds(off, chunk_n)] = h[0:1, :]
        out_ref[1:2, pl.ds(off, chunk_n)] = color


@functools.partial(jax.jit, static_argnames=("block_n", "chunk_n"))
def nerf_small_c_forward(x, params, *, block_n=DEFAULT_BLOCK_N,
                         chunk_n=DEFAULT_CHUNK_N):
    """x: (N, INPUT_CH) float32.  Returns (sigma (N,1), color (N,1))."""
    w0, w1, w2, cw0, cw1, cb = params
    N, C = x.shape
    assert C == INPUT_CH
    chunk_n = min(chunk_n, block_n)
    assert block_n % 128 == 0 and chunk_n % 128 == 0
    assert block_n % chunk_n == 0

    cdt = w0.dtype
    # Lane-dense input layout: points on the last (lane) axis; pad ragged N.
    # Under jit the transpose + cast + pad fuse into one XLA op.
    x_t = x.T.astype(cdt)                                            # (3, N)
    n_pad = (-N) % block_n
    if n_pad:
        x_t = jnp.pad(x_t, ((0, 0), (0, n_pad)))
    n_padded = N + n_pad
    grid = (n_padded // block_n,)

    # Constant index_map => weights DMA'd once and stay VMEM-resident.
    full = lambda a: pl.BlockSpec(a.shape, lambda i: (0, 0))

    kernel = functools.partial(_nerf_small_c_kernel, chunk_n=chunk_n)
    out = pl.pallas_call(
        kernel,
        out_shape=jax.ShapeDtypeStruct((2, n_padded), jnp.float32),
        grid_spec=pltpu.PrefetchScalarGridSpec(
            num_scalar_prefetch=0,
            grid=grid,
            in_specs=[
                pl.BlockSpec((INPUT_CH, block_n), lambda i: (0, i)),   # x tile
                full(w0), full(w1), full(w2),                          # sigma net
                full(cw0), full(cw1), full(cb),                        # color net
            ],
            out_specs=pl.BlockSpec((2, block_n), lambda i: (0, i)),
        ),
        compiler_params=pltpu.CompilerParams(
            dimension_semantics=("parallel",)),
    )(x_t, w0, w1, w2, cw0, cw1, cb)

    sigma = out[0, :N].reshape(N, 1)
    color = out[1, :N].reshape(N, 1)
    return sigma, color


def init_params(key, *, dtype=jnp.float32):
    """Deterministic synthetic parameters.

    Weights are kept in PyTorch Linear (out, in) layout so the kernel computes
    h = W @ x directly.  `dtype` controls the MXU operand dtype (float32 or
    bfloat16); biases always stay float32 (added post-accumulation)."""
    ks = jax.random.split(key, 7)
    scale = 0.1
    w0 = scale * jax.random.normal(ks[0], (HIDDEN_DIM, INPUT_CH),      jnp.float32)
    w1 = scale * jax.random.normal(ks[1], (HIDDEN_DIM, HIDDEN_DIM),    jnp.float32)
    w2 = scale * jax.random.normal(ks[2], (SIGMA_OUT_DIM, HIDDEN_DIM), jnp.float32)
    # color_net[0]: Linear(geo_feat_dim=15 -> 16, bias=True)
    cw0_raw = scale * jax.random.normal(ks[3], (HIDDEN_DIM_COLOR, GEO_FEAT_DIM), jnp.float32)
    cb0     = scale * jax.random.normal(ks[4], (HIDDEN_DIM_COLOR,), jnp.float32)
    # color_net[1]: Linear(16 -> 1, bias=True)
    cw1 = scale * jax.random.normal(ks[5], (1, HIDDEN_DIM_COLOR), jnp.float32)
    cb1 = scale * jax.random.normal(ks[6], (1,), jnp.float32)

    # Embed the 16<-15 color weight into a (16, 16) matrix with a ZERO first
    # COLUMN so cw0 @ h drops sigma channel 0 (== color_net[0](sigma[..., 1:])).
    # Invariant: column 0 must stay exactly zero.
    cw0 = jnp.concatenate(
        [jnp.zeros((HIDDEN_DIM_COLOR, 1), jnp.float32), cw0_raw], axis=1)

    # Pack both biases into a single small VMEM blob: col 0 = cb0, [0,1] = cb1.
    cb = jnp.zeros((HIDDEN_DIM_COLOR, 2), jnp.float32)
    cb = cb.at[:, 0].set(cb0).at[0, 1].set(cb1[0])

    params = (w0.astype(dtype), w1.astype(dtype), w2.astype(dtype),
              cw0.astype(dtype), cw1.astype(dtype), cb)
    raw = (w0, w1, w2, cw0_raw, cb0, cw1, cb1)
    return params, raw


def reference_forward(x, raw):
    """Pure-JAX reference mirroring the PyTorch NeRFSmall_c forward (float32)."""
    w0, w1, w2, cw0_raw, cb0, cw1, cb1 = raw
    h = x
    h = jnp.maximum(h @ w0.T, 0.0)
    h = jnp.maximum(h @ w1.T, 0.0)
    h = jnp.maximum(h @ w2.T, 0.0)          # ReLU after the last sigma layer too (per spec)
    sigma = h
    color = sigma[:, 1:] @ cw0_raw.T + cb0
    color = jnp.maximum(color, 0.0)
    color = color @ cw1.T + cb1
    return sigma[:, :1], color


if __name__ == "__main__":
    key = jax.random.PRNGKey(0)
    k_x, k_p = jax.random.split(key)

    N = 1000  # not a multiple of BLOCK_N — exercises the ragged-tail padding path
    x = jax.random.normal(k_x, (N, INPUT_CH), jnp.float32)

    params_f32, raw = init_params(k_p, dtype=jnp.float32)
    sigma_ref, color_ref = reference_forward(x, raw)

    # ---- float32 path, default block (single grid step, chunked inner loop) -
    sigma, color = nerf_small_c_forward(x, params_f32)
    jax.block_until_ready((sigma, color))
    assert sigma.shape == (N, 1) and color.shape == (N, 1)
    assert jnp.allclose(sigma, sigma_ref, atol=1e-5, rtol=1e-5)
    assert jnp.allclose(color, color_ref, atol=1e-5, rtol=1e-5)

    # ---- float32 path, small block (multi-step grid, single-chunk loop) -----
    sigma2, color2 = nerf_small_c_forward(x, params_f32, block_n=512, chunk_n=512)
    jax.block_until_ready((sigma2, color2))
    assert jnp.allclose(sigma2, sigma_ref, atol=1e-5, rtol=1e-5)
    assert jnp.allclose(color2, color_ref, atol=1e-5, rtol=1e-5)

    # ---- bf16 weights/inputs path (halved HBM reads, full-rate MXU);
    #      accumulation / bias / ReLU remain float32 ---------------------------
    params_bf16, _ = init_params(k_p, dtype=jnp.bfloat16)
    sigma_b, color_b = nerf_small_c_forward(x, params_bf16)
    jax.block_until_ready((sigma_b, color_b))
    assert jnp.allclose(sigma_b, sigma_ref, atol=5e-2, rtol=5e-2)
    assert jnp.allclose(color_b, color_ref, atol=5e-2, rtol=5e-2)

    print("KERNEL_OK")
</pallas_src>

<mosaic_0001>
module attributes {stable_mosaic.version = 11 : i64} {
  func.func @_nerf_small_c_kernel(%arg0: i32, %arg1: memref<3x2048xf32, #tpu.memory_space<vmem>>, %arg2: memref<64x3xf32, #tpu.memory_space<vmem>>, %arg3: memref<64x64xf32, #tpu.memory_space<vmem>>, %arg4: memref<16x64xf32, #tpu.memory_space<vmem>>, %arg5: memref<16x16xf32, #tpu.memory_space<vmem>>, %arg6: memref<1x16xf32, #tpu.memory_space<vmem>>, %arg7: memref<16x2xf32, #tpu.memory_space<vmem>>, %arg8: memref<2x2048xf32, #tpu.memory_space<vmem>>) attributes {dimension_semantics = [#tpu.dimension_semantics<parallel>], iteration_bounds = array<i64: 1>, scalar_prefetch = 0 : i64, scratch_operands = 0 : i64, tpu.core_type = #tpu.core_type<tc>, window_params = [{transform_indices = @transform_0, window_bounds = array<i64: 3, 2048>}, {pipeline_mode = #tpu.pipeline_mode<synchronous>, transform_indices = @transform_1, window_bounds = array<i64: 64, 3>}, {pipeline_mode = #tpu.pipeline_mode<synchronous>, transform_indices = @transform_2, window_bounds = array<i64: 64, 64>}, {pipeline_mode = #tpu.pipeline_mode<synchronous>, transform_indices = @transform_3, window_bounds = array<i64: 16, 64>}, {pipeline_mode = #tpu.pipeline_mode<synchronous>, transform_indices = @transform_4, window_bounds = array<i64: 16, 16>}, {pipeline_mode = #tpu.pipeline_mode<synchronous>, transform_indices = @transform_5, window_bounds = array<i64: 1, 16>}, {pipeline_mode = #tpu.pipeline_mode<synchronous>, transform_indices = @transform_6, window_bounds = array<i64: 16, 2>}, {transform_indices = @transform_7, window_bounds = array<i64: 2, 2048>}]} {
    %c0_i32 = arith.constant 0 : i32
    %c4_i32 = arith.constant 4 : i32
    %0 = arith.addi %c0_i32, %c4_i32 : i32
    %c1_i32 = arith.constant 1 : i32
    scf.for %arg9 = %c0_i32 to %0 step %c1_i32  : i32 {
      %c1_i32_1 = arith.constant 1 : i32
      %1 = arith.muli %arg9, %c1_i32_1 : i32
      %c0_i32_2 = arith.constant 0 : i32
      %2 = arith.addi %c0_i32_2, %1 : i32
      %c512_i32 = arith.constant 512 : i32
      %3 = arith.muli %2, %c512_i32 : i32
      %4 = tpu.assume_multiple %3, 512 : i32
      %c0 = arith.constant 0 : index
      %5 = arith.index_cast %4 : i32 to index
      %6 = vector.load %arg1[%c0, %5] : memref<3x2048xf32, #tpu.memory_space<vmem>>, vector<3x512xf32>
      %c0_3 = arith.constant 0 : index
      %c0_4 = arith.constant 0 : index
      %7 = vector.load %arg2[%c0_3, %c0_4] : memref<64x3xf32, #tpu.memory_space<vmem>>, vector<64x3xf32>
      %cst = arith.constant dense<0.000000e+00> : vector<64x512xf32>
      %8 = tpu.matmul %7, %6, %cst {dimension_numbers = #tpu.dot_dimension_numbers<[1], [0], [0], [1], [0, 0, 1, 1], [], []>} : vector<64x3xf32>, vector<3x512xf32>, vector<64x512xf32> -> vector<64x512xf32>
      %cst_5 = arith.constant 0.000000e+00 : f32
      %9 = vector.broadcast %cst_5 : f32 to vector<64x512xf32>
      %10 = arith.maximumf %8, %9 : vector<64x512xf32>
      %c0_6 = arith.constant 0 : index
      %c0_7 = arith.constant 0 : index
      %11 = vector.load %arg3[%c0_6, %c0_7] : memref<64x64xf32, #tpu.memory_space<vmem>>, vector<64x64xf32>
      %cst_8 = arith.constant dense<0.000000e+00> : vector<64x512xf32>
      %12 = tpu.matmul %11, %10, %cst_8 {dimension_numbers = #tpu.dot_dimension_numbers<[1], [0], [0], [1], [0, 0, 1, 1], [], []>} : vector<64x64xf32>, vector<64x512xf32>, vector<64x512xf32> -> vector<64x512xf32>
      %cst_9 = arith.constant 0.000000e+00 : f32
      %13 = vector.broadcast %cst_9 : f32 to vector<64x512xf32>
      %14 = arith.maximumf %12, %13 : vector<64x512xf32>
      %c0_10 = arith.constant 0 : index
      %c0_11 = arith.constant 0 : index
      %15 = vector.load %arg4[%c0_10, %c0_11] : memref<16x64xf32, #tpu.memory_space<vmem>>, vector<16x64xf32>
      %cst_12 = arith.constant dense<0.000000e+00> : vector<16x512xf32>
      %16 = tpu.matmul %15, %14, %cst_12 {dimension_numbers = #tpu.dot_dimension_numbers<[1], [0], [0], [1], [0, 0, 1, 1], [], []>} : vector<16x64xf32>, vector<64x512xf32>, vector<16x512xf32> -> vector<16x512xf32>
      %cst_13 = arith.constant 0.000000e+00 : f32
      %17 = vector.broadcast %cst_13 : f32 to vector<16x512xf32>
      %18 = arith.maximumf %16, %17 : vector<16x512xf32>
      %c0_14 = arith.constant 0 : index
      %c0_15 = arith.constant 0 : index
      %19 = vector.load %arg7[%c0_14, %c0_15] : memref<16x2xf32, #tpu.memory_space<vmem>>, vector<16x1xf32>
      %c0_16 = arith.constant 0 : index
      %c0_17 = arith.constant 0 : index
      %20 = vector.load %arg5[%c0_16, %c0_17] : memref<16x16xf32, #tpu.memory_space<vmem>>, vector<16x16xf32>
      %cst_18 = arith.constant dense<0.000000e+00> : vector<16x512xf32>
      %21 = tpu.matmul %20, %18, %cst_18 {dimension_numbers = #tpu.dot_dimension_numbers<[1], [0], [0], [1], [0, 0, 1, 1], [], []>} : vector<16x16xf32>, vector<16x512xf32>, vector<16x512xf32> -> vector<16x512xf32>
      %22 = vector.broadcast %19 : vector<16x1xf32> to vector<16x512xf32>
      %23 = arith.addf %21, %22 : vector<16x512xf32>
      %cst_19 = arith.constant 0.000000e+00 : f32
      %24 = vector.broadcast %cst_19 : f32 to vector<16x512xf32>
      %25 = arith.maximumf %23, %24 : vector<16x512xf32>
      %c0_20 = arith.constant 0 : index
      %c1 = arith.constant 1 : index
      %26 = vector.load %arg7[%c0_20, %c1] : memref<16x2xf32, #tpu.memory_space<vmem>>, vector<1x1xf32>
      %c0_21 = arith.constant 0 : index
      %c0_22 = arith.constant 0 : index
      %27 = vector.load %arg6[%c0_21, %c0_22] : memref<1x16xf32, #tpu.memory_space<vmem>>, vector<1x16xf32>
      %cst_23 = arith.constant dense<0.000000e+00> : vector<1x512xf32>
      %28 = tpu.matmul %27, %25, %cst_23 {dimension_numbers = #tpu.dot_dimension_numbers<[1], [0], [0], [1], [0, 0, 1, 1], [], []>} : vector<1x16xf32>, vector<16x512xf32>, vector<1x512xf32> -> vector<1x512xf32>
      %29 = vector.broadcast %26 : vector<1x1xf32> to vector<1x512xf32>
      %30 = arith.addf %28, %29 : vector<1x512xf32>
      %31 = vector.extract_strided_slice %18 {offsets = [0, 0], sizes = [1, 512], strides = [1, 1]} : vector<16x512xf32> to vector<1x512xf32>
      %c0_24 = arith.constant 0 : index
      %32 = arith.index_cast %4 : i32 to index
      %33 = vector.load %arg8[%c0_24, %32] : memref<2x2048xf32, #tpu.memory_space<vmem>>, vector<1x512xf32>
      tpu.vector_store %arg8[%c0_24, %32], %31 {strides = array<i32>} : memref<2x2048xf32, #tpu.memory_space<vmem>>, vector<1x512xf32>,
      %c1_25 = arith.constant 1 : index
      %34 = arith.index_cast %4 : i32 to index
      %35 = vector.load %arg8[%c1_25, %34] : memref<2x2048xf32, #tpu.memory_space<vmem>>, vector<1x512xf32>
      tpu.vector_store %arg8[%c1_25, %34], %30 {strides = array<i32>} : memref<2x2048xf32, #tpu.memory_space<vmem>>, vector<1x512xf32>,
    }
    %c4_i32_0 = arith.constant 4 : i32
    return
  }
  func.func @transform_0(%arg0: i32) -> (i32, i32) {
    %c0_i32 = arith.constant 0 : i32
    %c0_i32_0 = arith.constant 0 : i32
    return %c0_i32, %arg0 : i32, i32
  }
  func.func @transform_1(%arg0: i32) -> (i32, i32) {
    %c0_i32 = arith.constant 0 : i32
    %c0_i32_0 = arith.constant 0 : i32
    %c0_i32_1 = arith.constant 0 : i32
    return %c0_i32, %c0_i32_0 : i32, i32
  }
  func.func @transform_2(%arg0: i32) -> (i32, i32) {
    %c0_i32 = arith.constant 0 : i32
    %c0_i32_0 = arith.constant 0 : i32
    %c0_i32_1 = arith.constant 0 : i32
    return %c0_i32, %c0_i32_0 : i32, i32
  }
  func.func @transform_3(%arg0: i32) -> (i32, i32) {
    %c0_i32 = arith.constant 0 : i32
    %c0_i32_0 = arith.constant 0 : i32
    %c0_i32_1 = arith.constant 0 : i32
    return %c0_i32, %c0_i32_0 : i32, i32
  }
  func.func @transform_4(%arg0: i32) -> (i32, i32) {
    %c0_i32 = arith.constant 0 : i32
    %c0_i32_0 = arith.constant 0 : i32
    %c0_i32_1 = arith.constant 0 : i32
    return %c0_i32, %c0_i32_0 : i32, i32
  }
  func.func @transform_5(%arg0: i32) -> (i32, i32) {
    %c0_i32 = arith.constant 0 : i32
    %c0_i32_0 = arith.constant 0 : i32
    %c0_i32_1 = arith.constant 0 : i32
    return %c0_i32, %c0_i32_0 : i32, i32
  }
  func.func @transform_6(%arg0: i32) -> (i32, i32) {
    %c0_i32 = arith.constant 0 : i32
    %c0_i32_0 = arith.constant 0 : i32
    %c0_i32_1 = arith.constant 0 : i32
    return %c0_i32, %c0_i32_0 : i32, i32
  }
  func.func @transform_7(%arg0: i32) -> (i32, i32) {
    %c0_i32 = arith.constant 0 : i32
    %c0_i32_0 = arith.constant 0 : i32
    return %c0_i32, %arg0 : i32, i32
  }
}

</mosaic_0001>

<bundles_post_ra>
// kernel: nerf_small_c_forward.1
= control target key start
LH: loop header
LB: loop body
LE: loop exit
PB: predicated region body
PF: predicated region fallthrough
CT: control target
= control target key end

     0   :  { %s1418_s24 = smov 0   ;;  %s1613_s0 = inlined_call_operand.vmem [shape: f32[3,2048], index: 0, kind: input, shape index: {}]   ;;  %s1614_s1 = inlined_call_operand.vmem [shape: f32[64,3], index: 1, kind: input, shape index: {}]   ;;  %s1615_s2 = inlined_call_operand.vmem [shape: f32[64,64], index: 2, kind: input, shape index: {}]   ;;  %s1616_s3 = inlined_call_operand.vmem [shape: f32[16,64], index: 3, kind: input, shape index: {}]   ;;  %s1617_s4 = inlined_call_operand.vmem [shape: f32[16,16], index: 4, kind: input, shape index: {}]   ;;  %s1618_s5 = inlined_call_operand.vmem [shape: f32[1,16], index: 5, kind: input, shape index: {}]   ;;  %s1619_s6 = inlined_call_operand.vmem [shape: f32[16,2], index: 6, kind: input, shape index: {}]   ;;  %s1620_s7 = inlined_call_operand.vmem [shape: f32[2,2048], index: 7, kind: output, shape index: {}]  }
   0x1 LB: > { %v1374_v0 = vmov 0.0   ;;  %s1219_s25 = sshll.u32 %s1372_s24, 9  ;;  %vm76_vm0 = vcmask 1042432   ;;  %v39_v5 = vld [vmem:[%s1614_s1] sm:$0xff]  ;;  %vm51_vm1 = vcmask 23552   ;;  %v40_v6 = vld [vmem:[%s1614_s1 + $0x8] sm:$0xff]  ;;  %s1372_s24 = sphi %s1418_s24, %s31_s24  }
   0x2   : > { %149 = vmatprep.mubr.f32.mxu0 %v1374_v0  ;;  %262 = vmatprep.mubr.f32.mxu1 %v1374_v0  ;;  %s1426_s26 = sshra.s32 %s1219_s25, 7  ;;  %v41_v7 = vld [vmem:[%s1614_s1 + $0x10] sm:$0xff]  ;;  %v42_v8 = vld [vmem:[%s1614_s1 + $0x18] sm:$0xff]  ;;  %v43_v9 = vld [vmem:[%s1614_s1 + $0x20] sm:$0xff]  ;;  %vm351_vm2 = vcmask 523264   ;;  %vm818_vm4 = vcmask 130048  }
   0x3   : > { %s1220_s27 = sshll.u32 %s1426_s26, 2  ;;  %v44_v10 = vld [vmem:[%s1614_s1 + $0x28] sm:$0xff]  ;;  %v45_v11 = vld [vmem:[%s1614_s1 + $0x30] sm:$0xff]  ;;  %v46_v12 = vld [vmem:[%s1614_s1 + $0x38] sm:$0xff]  ;;  %s1267_s29 = sshll.u32 %s1426_s26, 1 }
   0x4   : > { %s36_s30 = scalar_lea.vmem %s1613_s0, %s1220_s27  ;;  %s1572_s9 = scalar_lea.vmem %s1620_s7, %s1267_s29 }
   0x5   : > { %v37_v1 = vld [vmem:[%s36_s30] sm:$0x77]  ;;  %v38_v2 = vld [vmem:[%s36_s30 + $0x8] sm:$0x77]  ;;  %s31_s24 = sadd.s32 1, %s1372_s24  }
   0x6   : > { %v49_v3 = vcombine.high %v37_v1, %v37_v1  ;;  %v50_v4 = vcombine.high %v38_v2, %v38_v2  ;;  %p28_p0 = scmp.ge.s32.totalorder %s31_s24, 4  }
   0x8   : > { %1221 = vmatprep.subr.msk.mxu0 %vm76_vm0, %v49_v3  ;;  %1231 = vmatprep.subr.msk.mxu1 %vm76_vm0, %v50_v4 }
   0x9   : > { %1222 = vmatpush1.msk.msra.mxu0 %vm76_vm0, %v37_v1  ;;  %1232 = vmatpush1.msk.msra.mxu1 %vm76_vm0, %v38_v2 }
   0xa   : > { %1223 = vmatmul.mubr.msk.f32.vlgmr.msra.gmra.mrb[0].mxu0 %vm51_vm1, %v39_v5  ;;  %1233 = vmatmul.mubr.msk.f32.vlgmr.msra.gmra.mrb[0].mxu1 %vm51_vm1, %v39_v5 }
   0xb   : > { %155 = vmatprep.mubr.f32.mxu0 %v1374_v0  ;;  %268 = vmatprep.mubr.f32.mxu1 %v1374_v0 }
   0xe   : > { %1224 = vmatmul.mubr.msk.f32.gmra.mrb[2].mxu0 %vm51_vm1, %v40_v6  ;;  %1234 = vmatmul.mubr.msk.f32.gmra.mrb[2].mxu1 %vm51_vm1, %v40_v6 }
   0xf   : > { %161 = vmatprep.mubr.f32.mxu0 %v1374_v0  ;;  %274 = vmatprep.mubr.f32.mxu1 %v1374_v0 }
  0x12   : > { %1225 = vmatmul.mubr.msk.f32.gmra.mrb[4].mxu0 %vm51_vm1, %v41_v7  ;;  %1235 = vmatmul.mubr.msk.f32.gmra.mrb[4].mxu1 %vm51_vm1, %v41_v7 }
  0x13   : > { %167 = vmatprep.mubr.f32.mxu0 %v1374_v0  ;;  %280 = vmatprep.mubr.f32.mxu1 %v1374_v0 }
  0x16   : > { %1226 = vmatmul.mubr.msk.f32.gmra.mrb[6].mxu0 %vm51_vm1, %v42_v8  ;;  %1236 = vmatmul.mubr.msk.f32.gmra.mrb[6].mxu1 %vm51_vm1, %v42_v8 }
  0x17   : > { %173 = vmatprep.mubr.f32.mxu0 %v1374_v0  ;;  %286 = vmatprep.mubr.f32.mxu1 %v1374_v0 }
  0x1a   : > { %1227 = vmatmul.mubr.msk.f32.gmra.mrb[8].mxu0 %vm51_vm1, %v43_v9  ;;  %1237 = vmatmul.mubr.msk.f32.gmra.mrb[8].mxu1 %vm51_vm1, %v43_v9 }
  0x1b   : > { %179 = vmatprep.mubr.f32.mxu0 %v1374_v0  ;;  %292 = vmatprep.mubr.f32.mxu1 %v1374_v0 }
  0x1e   : > { %1228 = vmatmul.mubr.msk.f32.gmra.mrb[10].mxu0 %vm51_vm1, %v44_v10  ;;  %1238 = vmatmul.mubr.msk.f32.gmra.mrb[10].mxu1 %vm51_vm1, %v44_v10 }
  0x1f   : > { %185 = vmatprep.mubr.f32.mxu0 %v1374_v0  ;;  %298 = vmatprep.mubr.f32.mxu1 %v1374_v0 }
  0x22   : > { %1229 = vmatmul.mubr.msk.f32.gmra.mrb[12].mxu0 %vm51_vm1, %v45_v11  ;;  %1239 = vmatmul.mubr.msk.f32.gmra.mrb[12].mxu1 %vm51_vm1, %v45_v11 }
  0x23   : > { %191 = vmatprep.mubr.f32.mxu0 %v1374_v0  ;;  %304 = vmatprep.mubr.f32.mxu1 %v1374_v0 }
  0x26   : > { %1230 = vmatmul.mubr.msk.f32.gmra.mrb[14].mxu0 %vm51_vm1, %v46_v12  ;;  %1240 = vmatmul.mubr.msk.f32.gmra.mrb[14].mxu1 %vm51_vm1, %v46_v12 }
  0x27   : > { %440 = vmatprep.mubr.f32.mxu0 %v1374_v0  ;;  %553 = vmatprep.mubr.f32.mxu1 %v1374_v0 }
  0xdd   : > { %v151_v13 = vpop.f32.mrb[0].mxu0  ;;  %v264_v14 = vpop.f32.mrb[0].mxu1 }
  0xde   : > { %v153_v15 = vpop.f32.mrb[1].mxu0  ;;  %v266_v16 = vpop.f32.mrb[1].mxu1  ;;  %v311_v19 = vmax.f32 %v151_v13, 0.0  ;;  %v313_v20 = vmax.f32 %v264_v14, 0.0 }
  0xdf   : > { %v312_v25 = vmax.f32 %v153_v15, 0.0  ;;  %v314_v26 = vmax.f32 %v266_v16, 0.0 }
  0xe1   : > { %v157_v17 = vpop.f32.mrb[2].mxu0  ;;  %v270_v18 = vpop.f32.mrb[2].mxu1 }
  0xe2   : > { %v315_v21 = vmax.f32 %v157_v17, 0.0  ;;  %v317_v22 = vmax.f32 %v270_v18, 0.0  ;;  %v159_v23 = vpop.f32.mrb[3].mxu0  ;;  %v272_v24 = vpop.f32.mrb[3].mxu1 }
  0xe3   : > { %v316_v27 = vmax.f32 %v159_v23, 0.0  ;;  %v318_v28 = vmax.f32 %v272_v24, 0.0 }
  0xe4   : > { %v1271_v29 = vpack.c.bf16 %v315_v21, %v311_v19  ;;  %v1287_v30 = vpack.c.bf16 %v317_v22, %v313_v20 }
  0xe5   : > { %v1269_v31 = vpack.c.bf16 %v316_v27, %v312_v25  ;;  %v1285_v32 = vpack.c.bf16 %v318_v28, %v314_v26  ;;  %v163_v33 = vpop.f32.mrb[4].mxu0  ;;  %v276_v34 = vpop.f32.mrb[4].mxu1 }
  0xe6   : > { %v165_v35 = vpop.f32.mrb[5].mxu0  ;;  %v278_v36 = vpop.f32.mrb[5].mxu1  ;;  %v319_v39 = vmax.f32 %v163_v33, 0.0  ;;  %v321_v40 = vmax.f32 %v276_v34, 0.0  ;;  %v346_v33 = vld [vmem:[%s1615_s2 + $0x18] sm:$0xff]  ;;  %v347_v34 = vld [vmem:[%s1615_s2 + $0x20] sm:$0xff] }
  0xe7   : > { %1270 = vmatprep.subr.bf16.mxu0 %v1269_v31  ;;  %1286 = vmatprep.subr.bf16.mxu1 %v1285_v32  ;;  %v320_v45 = vmax.f32 %v165_v35, 0.0  ;;  %v322_v46 = vmax.f32 %v278_v36, 0.0  ;;  %v344_v31 = vld [vmem:[%s1615_s2 + $0x8] sm:$0xff]  ;;  %v345_v32 = vld [vmem:[%s1615_s2 + $0x10] sm:$0xff] }
  0xe8   : > { %1272 = vmatpush1.bf16.msra.mxu0 %v1271_v29  ;;  %1288 = vmatpush1.bf16.msra.mxu1 %v1287_v30  ;;  %v343_v30 = vld [vmem:[%s1615_s2] sm:$0xff]  ;;  %v348_v35 = vld [vmem:[%s1615_s2 + $0x28] sm:$0xff]  ;;  %v349_v36 = vld [vmem:[%s1615_s2 + $0x30] sm:$0xff] }
  0xe9   : > { %v169_v37 = vpop.f32.mrb[6].mxu0  ;;  %v282_v38 = vpop.f32.mrb[6].mxu1 }
  0xea   : > { %v323_v41 = vmax.f32 %v169_v37, 0.0  ;;  %v325_v42 = vmax.f32 %v282_v38, 0.0  ;;  %v171_v43 = vpop.f32.mrb[7].mxu0  ;;  %v284_v44 = vpop.f32.mrb[7].mxu1  ;;  %v350_v37 = vld [vmem:[%s1615_s2 + $0x38] sm:$0xff] }
  0xeb   : > { %v324_v47 = vmax.f32 %v171_v43, 0.0  ;;  %v326_v48 = vmax.f32 %v284_v44, 0.0 }
  0xec   : > { %v1275_v49 = vpack.c.bf16 %v323_v41, %v319_v39  ;;  %v1291_v50 = vpack.c.bf16 %v325_v42, %v321_v40 }
  0xed   : > { %v1273_v51 = vpack.c.bf16 %v324_v47, %v320_v45  ;;  %v1289_v52 = vpack.c.bf16 %v326_v48, %v322_v46  ;;  %v175_v53 = vpop.f32.mrb[8].mxu0  ;;  %v288_v54 = vpop.f32.mrb[8].mxu1 }
  0xee   : > { %v177_v55 = vpop.f32.mrb[9].mxu0  ;;  %v290_v56 = vpop.f32.mrb[9].mxu1  ;;  %v327_v59 = vmax.f32 %v175_v53, 0.0  ;;  %v329_v60 = vmax.f32 %v288_v54, 0.0 }
  0xef   : > { %1274 = vmatprep.subr.bf16.mxu0 %v1273_v51  ;;  %1290 = vmatprep.subr.bf16.mxu1 %v1289_v52  ;;  %v328_v2 = vmax.f32 %v177_v55, 0.0  ;;  %v330_v3 = vmax.f32 %v290_v56, 0.0 }
  0xf0   : > { %1276 = vmatpush1.bf16.msra.mxu0 %v1275_v49  ;;  %1292 = vmatpush1.bf16.msra.mxu1 %v1291_v50 }
  0xf1   : > { %v181_v57 = vpop.f32.mrb[10].mxu0  ;;  %v294_v58 = vpop.f32.mrb[10].mxu1 }
  0xf2   : > { %v331_v61 = vmax.f32 %v181_v57, 0.0  ;;  %v333_v62 = vmax.f32 %v294_v58, 0.0  ;;  %v183_v63 = vpop.f32.mrb[11].mxu0  ;;  %v296_v1 = vpop.f32.mrb[11].mxu1 }
  0xf3   : > { %v332_v4 = vmax.f32 %v183_v63, 0.0  ;;  %v334_v5 = vmax.f32 %v296_v1, 0.0 }
  0xf4   : > { %v1279_v6 = vpack.c.bf16 %v331_v61, %v327_v59  ;;  %v1295_v7 = vpack.c.bf16 %v333_v62, %v329_v60 }
  0xf5   : > { %v1277_v8 = vpack.c.bf16 %v332_v4, %v328_v2  ;;  %v1293_v9 = vpack.c.bf16 %v334_v5, %v330_v3  ;;  %v187_v10 = vpop.f32.mrb[12].mxu0  ;;  %v300_v11 = vpop.f32.mrb[12].mxu1 }
  0xf6   : > { %v189_v12 = vpop.f32.mrb[13].mxu0  ;;  %v302_v13 = vpop.f32.mrb[13].mxu1  ;;  %v335_v16 = vmax.f32 %v187_v10, 0.0  ;;  %v337_v17 = vmax.f32 %v300_v11, 0.0 }
  0xf7   : > { %1278 = vmatprep.subr.bf16.mxu0 %v1277_v8  ;;  %1294 = vmatprep.subr.bf16.mxu1 %v1293_v9  ;;  %v336_v22 = vmax.f32 %v189_v12, 0.0  ;;  %v338_v23 = vmax.f32 %v302_v13, 0.0 }
  0xf8   : > { %1280 = vmatpush1.bf16.msra.mxu0 %v1279_v6  ;;  %1296 = vmatpush1.bf16.msra.mxu1 %v1295_v7 }
  0xf9   : > { %v193_v14 = vpop.f32.mrb[14].mxu0  ;;  %v306_v15 = vpop.f32.mrb[14].mxu1 }
  0xfa   : > { %v339_v18 = vmax.f32 %v193_v14, 0.0  ;;  %v341_v19 = vmax.f32 %v306_v15, 0.0  ;;  %v195_v20 = vpop.f32.mrb[15].mxu0  ;;  %v308_v21 = vpop.f32.mrb[15].mxu1 }
  0xfb   : > { %v340_v24 = vmax.f32 %v195_v20, 0.0  ;;  %v342_v25 = vmax.f32 %v308_v21, 0.0 }
  0xfc   : > { %v1283_v26 = vpack.c.bf16 %v339_v18, %v335_v16  ;;  %v1299_v27 = vpack.c.bf16 %v341_v19, %v337_v17 }
  0xfd   : > { %v1281_v28 = vpack.c.bf16 %v340_v24, %v336_v22  ;;  %v1297_v29 = vpack.c.bf16 %v342_v25, %v338_v23 }
  0xff   : > { %1282 = vmatprep.subr.bf16.mxu0 %v1281_v28  ;;  %1298 = vmatprep.subr.bf16.mxu1 %v1297_v29 }
 0x100   : > { %1284 = vmatpush1.bf16.msra.mxu0 %v1283_v26  ;;  %1300 = vmatpush1.bf16.msra.mxu1 %v1299_v27 }
 0x103   : > { %1241 = vmatmul.mubr.msk.f32.vlgmr.msra.gmra.mrb[16].mxu0 %vm351_vm2, %v343_v30  ;;  %1249 = vmatmul.mubr.msk.f32.vlgmr.msra.gmra.mrb[16].mxu1 %vm351_vm2, %v343_v30 }
 0x104   : > { %446 = vmatprep.mubr.f32.mxu0 %v1374_v0  ;;  %559 = vmatprep.mubr.f32.mxu1 %v1374_v0 }
 0x107   : > { %1242 = vmatmul.mubr.msk.f32.gmra.mrb[18].mxu0 %vm351_vm2, %v344_v31  ;;  %1250 = vmatmul.mubr.msk.f32.gmra.mrb[18].mxu1 %vm351_vm2, %v344_v31 }
 0x108   : > { %452 = vmatprep.mubr.f32.mxu0 %v1374_v0  ;;  %565 = vmatprep.mubr.f32.mxu1 %v1374_v0 }
 0x10b   : > { %1243 = vmatmul.mubr.msk.f32.gmra.mrb[20].mxu0 %vm351_vm2, %v345_v32  ;;  %1251 = vmatmul.mubr.msk.f32.gmra.mrb[20].mxu1 %vm351_vm2, %v345_v32 }
 0x10c   : > { %458 = vmatprep.mubr.f32.mxu0 %v1374_v0  ;;  %571 = vmatprep.mubr.f32.mxu1 %v1374_v0 }
 0x10f   : > { %1244 = vmatmul.mubr.msk.f32.gmra.mrb[22].mxu0 %vm351_vm2, %v346_v33  ;;  %1252 = vmatmul.mubr.msk.f32.gmra.mrb[22].mxu1 %vm351_vm2, %v346_v33 }
 0x110   : > { %464 = vmatprep.mubr.f32.mxu0 %v1374_v0  ;;  %577 = vmatprep.mubr.f32.mxu1 %v1374_v0 }
 0x113   : > { %1245 = vmatmul.mubr.msk.f32.gmra.mrb[24].mxu0 %vm351_vm2, %v347_v34  ;;  %1253 = vmatmul.mubr.msk.f32.gmra.mrb[24].mxu1 %vm351_vm2, %v347_v34 }
 0x114   : > { %470 = vmatprep.mubr.f32.mxu0 %v1374_v0  ;;  %583 = vmatprep.mubr.f32.mxu1 %v1374_v0 }
 0x117   : > { %1246 = vmatmul.mubr.msk.f32.gmra.mrb[26].mxu0 %vm351_vm2, %v348_v35  ;;  %1254 = vmatmul.mubr.msk.f32.gmra.mrb[26].mxu1 %vm351_vm2, %v348_v35 }
 0x118   : > { %476 = vmatprep.mubr.f32.mxu0 %v1374_v0  ;;  %589 = vmatprep.mubr.f32.mxu1 %v1374_v0 }
 0x11b   : > { %1247 = vmatmul.mubr.msk.f32.gmra.mrb[28].mxu0 %vm351_vm2, %v349_v36  ;;  %1255 = vmatmul.mubr.msk.f32.gmra.mrb[28].mxu1 %vm351_vm2, %v349_v36 }
 0x11c   : > { %482 = vmatprep.mubr.f32.mxu0 %v1374_v0  ;;  %595 = vmatprep.mubr.f32.mxu1 %v1374_v0 }
 0x11f   : > { %1248 = vmatmul.mubr.msk.f32.gmra.mrb[30].mxu0 %vm351_vm2, %v350_v37  ;;  %1256 = vmatmul.mubr.msk.f32.gmra.mrb[30].mxu1 %vm351_vm2, %v350_v37 }
 0x120   : > { %706 = vmatprep.mubr.f32.mxu0 %v1374_v0  ;;  %783 = vmatprep.mubr.f32.mxu1 %v1374_v0 }
 0x1d6   : > { %v442_v38 = vpop.f32.mrb[16].mxu0  ;;  %v555_v39 = vpop.f32.mrb[16].mxu1 }
 0x1d7   : > { %v444_v40 = vpop.f32.mrb[17].mxu0  ;;  %v557_v41 = vpop.f32.mrb[17].mxu1  ;;  %v602_v44 = vmax.f32 %v442_v38, 0.0  ;;  %v604_v45 = vmax.f32 %v555_v39, 0.0 }
 0x1d8   : > { %v603_v50 = vmax.f32 %v444_v40, 0.0  ;;  %v605_v51 = vmax.f32 %v557_v41, 0.0 }
 0x1da   : > { %v448_v42 = vpop.f32.mrb[18].mxu0  ;;  %v561_v43 = vpop.f32.mrb[18].mxu1 }
 0x1db   : > { %v606_v46 = vmax.f32 %v448_v42, 0.0  ;;  %v608_v47 = vmax.f32 %v561_v43, 0.0  ;;  %v450_v48 = vpop.f32.mrb[19].mxu0  ;;  %v563_v49 = vpop.f32.mrb[19].mxu1 }
 0x1dc   : > { %v607_v52 = vmax.f32 %v450_v48, 0.0  ;;  %v609_v53 = vmax.f32 %v563_v49, 0.0 }
 0x1dd   : > { %v1303_v54 = vpack.c.bf16 %v606_v46, %v602_v44  ;;  %v1319_v55 = vpack.c.bf16 %v608_v47, %v604_v45 }
 0x1de   : > { %v1301_v56 = vpack.c.bf16 %v607_v52, %v603_v50  ;;  %v1317_v57 = vpack.c.bf16 %v609_v53, %v605_v51  ;;  %v454_v58 = vpop.f32.mrb[20].mxu0  ;;  %v567_v59 = vpop.f32.mrb[20].mxu1 }
 0x1df   : > { %v456_v60 = vpop.f32.mrb[21].mxu0  ;;  %v569_v61 = vpop.f32.mrb[21].mxu1  ;;  %v610_v1 = vmax.f32 %v454_v58, 0.0  ;;  %v612_v2 = vmax.f32 %v567_v59, 0.0  ;;  %v1375_v58 = vmov 0   ;;  %v805_v59 = vld [vmem:[%s1619_s6 + $0x8] sm:$0xff] }
 0x1e0   : > { %1302 = vmatprep.subr.bf16.mxu0 %v1301_v56  ;;  %1318 = vmatprep.subr.bf16.mxu1 %v1317_v57  ;;  %v611_v7 = vmax.f32 %v456_v60, 0.0  ;;  %v613_v8 = vmax.f32 %v569_v61, 0.0  ;;  %v635_v56 = vld [vmem:[%s1616_s3 + $0x8] sm:$0xff]  ;;  %v804_v57 = vld [vmem:[%s1619_s6] sm:$0xff]  ;;  %v1376_v60 = vmov 1966171168  }
 0x1e1   : > { %1304 = vmatpush1.bf16.msra.mxu0 %v1303_v54  ;;  %1320 = vmatpush1.bf16.msra.mxu1 %v1319_v55  ;;  %v634_v55 = vld [vmem:[%s1616_s3] sm:$0xff]  ;;  %v1146_v61 = vunpack.c.l.s4 %v1376_v60 }
 0x1e2   : > { %v460_v62 = vpop.f32.mrb[22].mxu0  ;;  %v573_v63 = vpop.f32.mrb[22].mxu1  ;;  %1361 = vset.pattern.permute.xlu0 %v1375_v58 }
 0x1e3   : > { %v614_v3 = vmax.f32 %v460_v62, 0.0  ;;  %v616_v4 = vmax.f32 %v573_v63, 0.0  ;;  %v462_v5 = vpop.f32.mrb[23].mxu0  ;;  %v575_v6 = vpop.f32.mrb[23].mxu1  ;;  %810 = vperm.xlu0 %1361, %v804_v57   ;;  %v1148_v62 = vlaneseq  ;;  %v1147_v63 = vunpack.c.0.s8 %v1146_v61 }
 0x1e4   : > { %v615_v9 = vmax.f32 %v462_v5, 0.0  ;;  %v617_v10 = vmax.f32 %v575_v6, 0.0 }
 0x1e5   : > { %v1307_v11 = vpack.c.bf16 %v614_v3, %v610_v1  ;;  %v1323_v12 = vpack.c.bf16 %v616_v4, %v612_v2  ;;  %v1149_v1 = vshrl.u32 %v1148_v62, 7  ;;  %vm1574_vm3 = vcmp.lt.s32.totalorder %v1148_v62, 512 }
 0x1e6   : > { %v1305_v13 = vpack.c.bf16 %v615_v9, %v611_v7  ;;  %v1321_v14 = vpack.c.bf16 %v617_v10, %v613_v8  ;;  %v466_v15 = vpop.f32.mrb[24].mxu0  ;;  %v579_v16 = vpop.f32.mrb[24].mxu1 }
 0x1e7   : > { %v468_v17 = vpop.f32.mrb[25].mxu0  ;;  %v581_v18 = vpop.f32.mrb[25].mxu1  ;;  %v618_v21 = vmax.f32 %v466_v15, 0.0  ;;  %v620_v22 = vmax.f32 %v579_v16, 0.0  ;;  %815 = vperm.xlu0 %1361, %v805_v59   ;;  %v1564_v9 = vsub.s32 %v1147_v63, %v1149_v1  ;;  %v988_v63 = vld [vmem:[%s1618_s5] sm:$0x1] }
 0x1e8   : > { %1306 = vmatprep.subr.bf16.mxu0 %v1305_v13  ;;  %1322 = vmatprep.subr.bf16.mxu1 %v1321_v14  ;;  %v619_v27 = vmax.f32 %v468_v17, 0.0  ;;  %v621_v28 = vmax.f32 %v581_v18, 0.0 }
 0x1e9   : > { %1308 = vmatpush1.bf16.msra.mxu0 %v1307_v11  ;;  %1324 = vmatpush1.bf16.msra.mxu1 %v1323_v12 }
 0x1ea   : > { %v472_v19 = vpop.f32.mrb[26].mxu0  ;;  %v585_v20 = vpop.f32.mrb[26].mxu1 }
 0x1eb   : > { %v622_v23 = vmax.f32 %v472_v19, 0.0  ;;  %v624_v24 = vmax.f32 %v585_v20, 0.0  ;;  %v474_v25 = vpop.f32.mrb[27].mxu0  ;;  %v587_v26 = vpop.f32.mrb[27].mxu1 }
 0x1ec   : > { %v623_v29 = vmax.f32 %v474_v25, 0.0  ;;  %v625_v30 = vmax.f32 %v587_v26, 0.0 }
 0x1ed   : > { %v1311_v31 = vpack.c.bf16 %v622_v23, %v618_v21  ;;  %v1327_v32 = vpack.c.bf16 %v624_v24, %v620_v22 }
 0x1ee   : > { %v1309_v33 = vpack.c.bf16 %v623_v29, %v619_v27  ;;  %v1325_v34 = vpack.c.bf16 %v625_v30, %v621_v28  ;;  %v478_v35 = vpop.f32.mrb[28].mxu0  ;;  %v591_v36 = vpop.f32.mrb[28].mxu1  ;;  %v806_v30 = vld [vmem:[%s1617_s4] sm:$0xff] }
 0x1ef   : > { %v480_v37 = vpop.f32.mrb[29].mxu0  ;;  %v593_v38 = vpop.f32.mrb[29].mxu1  ;;  %v626_v41 = vmax.f32 %v478_v35, 0.0  ;;  %v628_v42 = vmax.f32 %v591_v36, 0.0 }
 0x1f0   : > { %1310 = vmatprep.subr.bf16.mxu0 %v1309_v33  ;;  %1326 = vmatprep.subr.bf16.mxu1 %v1325_v34  ;;  %v627_v47 = vmax.f32 %v480_v37, 0.0  ;;  %v629_v48 = vmax.f32 %v593_v38, 0.0  ;;  %v1377_v33 = vmov 1  }
 0x1f1   : > { %1312 = vmatpush1.bf16.msra.mxu0 %v1311_v31  ;;  %1328 = vmatpush1.bf16.msra.mxu1 %v1327_v32  ;;  %v807_v31 = vld [vmem:[%s1617_s4 + $0x8] sm:$0xff]  ;;  %v987_v32 = vld [vmem:[%s1619_s6] sm:$0x1] }
 0x1f2   : > { %v484_v39 = vpop.f32.mrb[30].mxu0  ;;  %v597_v40 = vpop.f32.mrb[30].mxu1  ;;  %1362 = vset.pattern.permute.xlu1 %v1377_v33  ;;  %1363 = vset.pattern.permute.xlu0 %v1377_v33 }
 0x1f3   : > { %v630_v43 = vmax.f32 %v484_v39, 0.0  ;;  %v632_v44 = vmax.f32 %v597_v40, 0.0  ;;  %v486_v45 = vpop.f32.mrb[31].mxu0  ;;  %v599_v46 = vpop.f32.mrb[31].mxu1  ;;  %991 = vperm.xlu1 %1362, %v987_v32  }
 0x1f4   : > { %v631_v49 = vmax.f32 %v486_v45, 0.0  ;;  %v633_v50 = vmax.f32 %v599_v46, 0.0 }
 0x1f5   : > { %v1315_v51 = vpack.c.bf16 %v630_v43, %v626_v41  ;;  %v1331_v52 = vpack.c.bf16 %v632_v44, %v628_v42 }
 0x1f6   : > { %v1313_v53 = vpack.c.bf16 %v631_v49, %v627_v47  ;;  %v1329_v54 = vpack.c.bf16 %v633_v50, %v629_v48 }
 0x1f8   : > { %1314 = vmatprep.subr.bf16.mxu0 %v1313_v53  ;;  %1330 = vmatprep.subr.bf16.mxu1 %v1329_v54 }
 0x1f9   : > { %1316 = vmatpush1.bf16.msra.mxu0 %v1315_v51  ;;  %1332 = vmatpush1.bf16.msra.mxu1 %v1331_v52 }
 0x1fc   : > { %1257 = vmatmul.mubr.msk.f32.vlgmr.msra.gmra.mrb[32].mxu0 %vm351_vm2, %v634_v55  ;;  %1259 = vmatmul.mubr.msk.f32.vlgmr.msra.gmra.mrb[32].mxu1 %vm351_vm2, %v634_v55 }
 0x1fd   : > { %712 = vmatprep.mubr.f32.mxu0 %v1374_v0  ;;  %789 = vmatprep.mubr.f32.mxu1 %v1374_v0 }
 0x200   : > { %1258 = vmatmul.mubr.msk.f32.gmra.mrb[34].mxu0 %vm351_vm2, %v635_v56  ;;  %1260 = vmatmul.mubr.msk.f32.gmra.mrb[34].mxu1 %vm351_vm2, %v635_v56 }
 0x201   : > { %889 = vmatprep.mubr.f32.mxu0 %v1374_v0  ;;  %966 = vmatprep.mubr.f32.mxu1 %v1374_v0 }
 0x262   : > { %v811_v34 = vpop.permute.xlu0 %810 }
 0x266   : > { %v816_v41 = vpop.permute.xlu0 %815 }
 0x272   : > { %v992_v1 = vpop.permute.xlu1 %991 }
 0x2cf   : > { %v708_v2 = vpop.f32.mrb[32].mxu0  ;;  %v785_v3 = vpop.f32.mrb[32].mxu1 }
 0x2d0   : > { %v796_v4 = vmax.f32 %v708_v2, 0.0  ;;  %v798_v5 = vmax.f32 %v785_v3, 0.0  ;;  %v710_v6 = vpop.f32.mrb[33].mxu0  ;;  %v787_v7 = vpop.f32.mrb[33].mxu1 }
 0x2d1   : > { %v797_v8 = vmax.f32 %v710_v6, 0.0  ;;  %v799_v10 = vmax.f32 %v787_v7, 0.0 }
 0x2d3   : > { %v1143_v11 = vcombine.low %v796_v4, %v797_v8  ;;  %v1144_v12 = vcombine.low %v798_v5, %v799_v10  ;;  %v714_v13 = vpop.f32.mrb[34].mxu0  ;;  %v791_v14 = vpop.f32.mrb[34].mxu1 }
 0x2d4   : > { %v800_v15 = vmax.f32 %v714_v13, 0.0  ;;  %v802_v16 = vmax.f32 %v791_v14, 0.0  ;;  %v716_v17 = vpop.f32.mrb[35].mxu0  ;;  %v793_v18 = vpop.f32.mrb[35].mxu1 }
 0x2d5   : > { %v1151_v19 = vrot.slane %v1143_v11, %v1564_v9  ;;  %v1158_v20 = vrot.slane %v1144_v12, %v1564_v9  ;;  %v801_v21 = vmax.f32 %v716_v17, 0.0  ;;  %v803_v22 = vmax.f32 %v793_v18, 0.0 }
 0x2d6   : > { %v1335_v23 = vpack.c.bf16 %v800_v15, %v796_v4  ;;  %v1339_v24 = vpack.c.bf16 %v802_v16, %v798_v5 }
 0x2d7   : > { %v1159_v25 = vcombine.low %v1151_v19, %v1158_v20  ;;  %v1333_v26 = vpack.c.bf16 %v801_v21, %v797_v8  ;;  %v1337_v27 = vpack.c.bf16 %v803_v22, %v799_v10 }
 0x2d9   : > { %v1166_v29 = vrot.slane %v1159_v25, %v1564_v9  ;;  %1334 = vmatprep.subr.bf16.mxu0 %v1333_v26  ;;  %1338 = vmatprep.subr.bf16.mxu1 %v1337_v27 }
 0x2da   : > { %1336 = vmatpush1.bf16.msra.mxu0 %v1335_v23  ;;  %1340 = vmatpush1.bf16.msra.mxu1 %v1339_v24 }
 0x2db   : > { %1174 = vst.msk [vmem:[%s1572_s9] ss:$2 sm:$0xf] %vm1574_vm3, %v1166_v29 }
 0x2dd   : > { %1261 = vmatmul.mubr.msk.f32.vlgmr.msra.gmra.mrb[36].mxu0 %vm818_vm4, %v806_v30  ;;  %1263 = vmatmul.mubr.msk.f32.vlgmr.msra.gmra.mrb[36].mxu1 %vm818_vm4, %v806_v30 }
 0x2de   : > { %895 = vmatprep.mubr.f32.mxu0 %v1374_v0  ;;  %972 = vmatprep.mubr.f32.mxu1 %v1374_v0 }
 0x2e1   : > { %1262 = vmatmul.mubr.msk.f32.gmra.mrb[38].mxu0 %vm818_vm4, %v807_v31  ;;  %1264 = vmatmul.mubr.msk.f32.gmra.mrb[38].mxu1 %vm818_vm4, %v807_v31 }
 0x2e2   : > { %1061 = vmatprep.mubr.f32.mxu0 %v1374_v0  ;;  %1132 = vmatprep.mubr.f32.mxu1 %v1374_v0 }
 0x3b0   : > { %v891_v35 = vpop.f32.mrb[36].mxu0  ;;  %v968_v36 = vpop.f32.mrb[36].mxu1 }
 0x3b1   : > { %v893_v37 = vpop.f32.mrb[37].mxu0  ;;  %v970_v38 = vpop.f32.mrb[37].mxu1  ;;  %v892_v39 = vadd.f32 %v891_v35, %v811_v34  ;;  %v969_v40 = vadd.f32 %v968_v36, %v811_v34 }
 0x3b2   : > { %v894_v42 = vadd.f32 %v893_v37, %v811_v34  ;;  %v971_v43 = vadd.f32 %v970_v38, %v811_v34 }
 0x3b3   : > { %v979_v51 = vmax.f32 %v892_v39, 0.0  ;;  %v981_v52 = vmax.f32 %v969_v40, 0.0 }
 0x3b4   : > { %v897_v44 = vpop.f32.mrb[38].mxu0  ;;  %v974_v0 = vpop.f32.mrb[38].mxu1  ;;  %v980_v55 = vmax.f32 %v894_v42, 0.0  ;;  %v982_v56 = vmax.f32 %v971_v43, 0.0 }
 0x3b5   : > { %v898_v45 = vadd.f32 %v897_v44, %v816_v41  ;;  %v975_v46 = vadd.f32 %v974_v0, %v816_v41  ;;  %v899_v47 = vpop.f32.mrb[39].mxu0  ;;  %v976_v48 = vpop.f32.mrb[39].mxu1 }
 0x3b6   : > { %v900_v49 = vadd.f32 %v899_v47, %v816_v41  ;;  %v977_v50 = vadd.f32 %v976_v48, %v816_v41 }
 0x3b7   : > { %v983_v53 = vmax.f32 %v898_v45, 0.0  ;;  %v985_v54 = vmax.f32 %v975_v46, 0.0 }
 0x3b8   : > { %v984_v57 = vmax.f32 %v900_v49, 0.0  ;;  %v986_v58 = vmax.f32 %v977_v50, 0.0 }
 0x3b9   : > { %v1343_v59 = vpack.c.bf16 %v983_v53, %v979_v51  ;;  %v1347_v60 = vpack.c.bf16 %v985_v54, %v981_v52 }
 0x3ba   : > { %v1341_v61 = vpack.c.bf16 %v984_v57, %v980_v55  ;;  %v1345_v62 = vpack.c.bf16 %v986_v58, %v982_v56 }
 0x3bc   : > { %1342 = vmatprep.subr.bf16.mxu0 %v1341_v61  ;;  %1346 = vmatprep.subr.bf16.mxu1 %v1345_v62 }
 0x3bd   : > { %1344 = vmatpush1.bf16.msra.mxu0 %v1343_v59  ;;  %1348 = vmatpush1.bf16.msra.mxu1 %v1347_v60 }
 0x3c0   : > { %1265 = vmatmul.mubr.msk.f32.vlgmr.msra.gmra.mrb[40].mxu0 %vm818_vm4, %v988_v63  ;;  %1266 = vmatmul.mubr.msk.f32.vlgmr.msra.gmra.mrb[40].mxu1 %vm818_vm4, %v988_v63 }
 0x493   : > { %v1063_v2 = vpop.f32.mrb[40].mxu0  ;;  %v1134_v3 = vpop.f32.mrb[40].mxu1 }
 0x494   : > { %v1064_v4 = vadd.f32 %v1063_v2, %v992_v1  ;;  %v1135_v5 = vadd.f32 %v1134_v3, %v992_v1  ;;  %v1065_v6 = vpop.f32.mrb[41].mxu0  ;;  %v1136_v7 = vpop.f32.mrb[41].mxu1 }
 0x495   : > { %v1066_v8 = vadd.f32 %v1065_v6, %v992_v1  ;;  %v1137_v10 = vadd.f32 %v1136_v7, %v992_v1 }
 0x497   : > { %v1179_v11 = vcombine.low %v1064_v4, %v1066_v8  ;;  %v1180_v12 = vcombine.low %v1135_v5, %v1137_v10 }
 0x499   : > { %v1187_v13 = vrot.slane %v1179_v11, %v1564_v9  ;;  %v1194_v14 = vrot.slane %v1180_v12, %v1564_v9  ;;  %30 = sbr.rel (!%p28_p0) target bundleno = 1 (0x1), region = 58 }
 0x49b   : > { %v1195_v15 = vcombine.low %v1187_v13, %v1194_v14 }
 0x49d   : > { %v1202_v16 = vrot.slane %v1195_v15, %v1564_v9 }
 0x49f   : > { %1268 = vst.msk [vmem:[%s1572_s9 + $0x1] ss:$2 sm:$0xf] %vm1574_vm3, %v1202_v16 }

</bundles_post_ra>
